<compile_context>
chip_gen: v6e
topology: v6e:2x2x1
jax: 0.10.0
libtpu: 0.0.40
codegen_flags: <defaults>
</compile_context>

<pallas_src>
import functools

import jax
import jax.numpy as jnp
from jax.experimental import pallas as pl
from jax.experimental.pallas import tpu as pltpu


def _round_up(x, m):
    return ((x + m - 1) // m) * m


@functools.lru_cache(maxsize=None)
def _device_limits():
    """(TM_MAX, TN_MAX, vmem_limit_bytes) picked from the chip's VMEM size."""
    try:
        vmem = int(getattr(pltpu.get_tpu_info(), "vmem_capacity_bytes", 0))
    except Exception:
        vmem = 0
    if vmem >= 100 * 1024 * 1024:            # v5e / v6e: 128 MiB VMEM
        return 512, 2048, 96 * 1024 * 1024
    return 256, 1024, 48 * 1024 * 1024       # v7x: 64 MiB VMEM (conservative)


# ------------------------- Pallas kernels -------------------------

def _mm_kernel(*refs, affine, relu, with_stats):
    """MXU matmul, optional fused BN-affine+ReLU prologue, optional fused
    per-column [sum; sumsq] epilogue accumulated in VMEM scratch."""
    it = iter(refs)
    a_ref = next(it)
    if affine:
        scale_ref = next(it)
        shift_ref = next(it)
    b_ref = next(it)
    o_ref = next(it)
    if with_stats:
        stats_ref = next(it)
        acc_ref = next(it)

    if affine:
        # Previous layer's BatchNorm affine + ReLU (f32 math on the VPU,
        # bf16 operands fed to the MXU).
        x = a_ref[...].astype(jnp.float32) * scale_ref[...] + shift_ref[...]
        if relu:
            x = jnp.maximum(x, 0.0)
        x = x.astype(jnp.bfloat16)
    else:
        x = a_ref[...]

    y = jnp.dot(x, b_ref[...], preferred_element_type=jnp.float32)
    o_ref[...] = y.astype(o_ref.dtype)          # bf16 store: halves HBM writes

    if with_stats:
        # This layer's BatchNorm statistics over the inner (M) grid axis.
        mi = pl.program_id(1)

        @pl.when(mi == 0)
        def _():
            acc_ref[...] = jnp.zeros_like(acc_ref)

        acc_ref[0:1, :] += jnp.sum(y, axis=0, keepdims=True)
        acc_ref[1:2, :] += jnp.sum(y * y, axis=0, keepdims=True)

        @pl.when(mi == pl.num_programs(1) - 1)
        def _():
            stats_ref[...] = acc_ref[...]


def pallas_matmul(a, b, scale=None, shift=None, relu=False, with_stats=False):
    """(M, K) @ (K, N): bf16 operands, f32 MXU accumulation, bf16 output.

    Optional fused prologue: relu(a * scale + shift) per input column (the
    previous layer's BatchNorm affine + ReLU).
    Optional fused epilogue: per-output-column [sum; sumsq] -> (2, N) f32
    accumulated over the row grid (this layer's BatchNorm statistics).
    """
    affine = scale is not None
    # Padded (zero) M rows would become relu(shift) != 0 under the affine
    # prologue and corrupt the fused column statistics; never combine them.
    assert not (affine and with_stats)

    m, k = a.shape
    n = b.shape[1]
    tm_max, tn_max, vmem_limit = _device_limits()

    a = a.astype(jnp.bfloat16)
    b = b.astype(jnp.bfloat16)

    # ---- tile selection: minimize padding, keep N lane-dense (128-mult) ----
    r_m = pl.cdiv(m, tm_max)
    npad0 = _round_up(n, 128)
    r_n = pl.cdiv(npad0, tn_max)

    # Guarantee >= 2 blocks on a parallel axis so a 2-TC chip (v7x) is not
    # half idle.  stats mode: only N is parallel (M is the accumulation axis).
    if with_stats:
        if r_n == 1 and npad0 % 256 == 0:
            r_n = 2
    else:
        if r_m * r_n == 1:
            if _round_up(m, 8) >= 16:
                r_m = 2
            elif npad0 % 256 == 0:
                r_n = 2

    tm = _round_up(pl.cdiv(m, r_m), 8)
    mp = _round_up(m, tm)
    m_blocks = mp // tm
    tn = 128 * pl.cdiv(npad0 // 128, r_n)
    npad = _round_up(npad0, tn)
    n_blocks = npad // tn

    if mp != m:
        a = jnp.pad(a, ((0, mp - m), (0, 0)))
    if npad != n:
        b = jnp.pad(b, ((0, 0), (0, npad - n)))

    kernel = functools.partial(_mm_kernel, affine=affine, relu=relu,
                               with_stats=with_stats)
    cparams = pltpu.CompilerParams(
        dimension_semantics=(("parallel", "arbitrary") if with_stats
                             else ("parallel", "parallel")),
        vmem_limit_bytes=vmem_limit)

    if with_stats:
        # Grid: N outer ('parallel'), M inner ('arbitrary' accumulation axis).
        # The weight tile is fetched once per N block; A (small) re-streams.
        y, stats = pl.pallas_call(
            kernel,
            out_shape=(jax.ShapeDtypeStruct((mp, npad), jnp.bfloat16),
                       jax.ShapeDtypeStruct((2, npad), jnp.float32)),
            grid=(n_blocks, m_blocks),
            in_specs=[pl.BlockSpec((tm, k), lambda j, i: (i, 0)),
                      pl.BlockSpec((k, tn), lambda j, i: (0, j))],
            out_specs=(pl.BlockSpec((tm, tn), lambda j, i: (i, j)),
                       pl.BlockSpec((2, tn), lambda j, i: (0, j))),
            scratch_shapes=[pltpu.VMEM((2, tn), jnp.float32)],
            compiler_params=cparams,
        )(a, b)
        if mp != m or npad != n:
            y = y[:m, :n]
            stats = stats[:, :n]
        return y, stats

    # Grid: M outer, N inner -> the large activation tile is DMA'd once per M
    # block; only the tiny (K, tn) weight tile is re-streamed per N block and
    # the affine-prologue recompute is negligible VPU work.
    in_specs = [pl.BlockSpec((tm, k), lambda i, j: (i, 0))]
    args = [a]
    if affine:
        in_specs += [pl.BlockSpec((1, k), lambda i, j: (0, 0)),
                     pl.BlockSpec((1, k), lambda i, j: (0, 0))]
        args += [scale.reshape(1, k).astype(jnp.float32),
                 shift.reshape(1, k).astype(jnp.float32)]
    in_specs.append(pl.BlockSpec((k, tn), lambda i, j: (0, j)))
    args.append(b)

    y = pl.pallas_call(
        kernel,
        out_shape=jax.ShapeDtypeStruct((mp, npad), jnp.bfloat16),
        grid=(m_blocks, n_blocks),
        in_specs=in_specs,
        out_specs=pl.BlockSpec((tm, tn), lambda i, j: (i, j)),
        compiler_params=cparams,
    )(*args)
    if mp != m or npad != n:
        y = y[:m, :n]
    return y


def _stats_kernel(x_ref, o_ref, acc_ref):
    @pl.when(pl.program_id(0) == 0)
    def _():
        acc_ref[...] = jnp.zeros_like(acc_ref)

    x = x_ref[...].astype(jnp.float32)
    acc_ref[0:1, :] += jnp.sum(x, axis=0, keepdims=True)
    acc_ref[1:2, :] += jnp.sum(x * x, axis=0, keepdims=True)

    @pl.when(pl.program_id(0) == pl.num_programs(0) - 1)
    def _():
        o_ref[...] = acc_ref[...]


def pallas_bn_stats(x2d):
    """Per-channel [sum; sum of squares] -> (2, C) for training-mode BN.

    Rows are regrouped so the lane width is >= 128 even for small C (channel
    sums are invariant to the regrouping); row tiles go up to 1024 so this
    HBM-read-bound pass sits near the roofline."""
    m, c = x2d.shape
    g = 1
    if c < 128:
        g = max(1, 128 // c)
        while g > 1 and m % g != 0:
            g //= 2
    xg = x2d.reshape(m // g, g * c)
    rows, cg = xg.shape
    r = pl.cdiv(rows, 1024)
    tile = _round_up(pl.cdiv(rows, r), 8)
    rows_p = _round_up(rows, tile)
    if rows_p != rows:
        xg = jnp.pad(xg, ((0, rows_p - rows), (0, 0)))

    _, _, vmem_limit = _device_limits()
    stats = pl.pallas_call(
        _stats_kernel,
        out_shape=jax.ShapeDtypeStruct((2, cg), jnp.float32),
        grid=(rows_p // tile,),
        in_specs=[pl.BlockSpec((tile, cg), lambda i: (i, 0))],
        out_specs=pl.BlockSpec((2, cg), lambda i: (0, 0)),
        scratch_shapes=[pltpu.VMEM((2, cg), jnp.float32)],
        compiler_params=pltpu.CompilerParams(
            dimension_semantics=("arbitrary",),
            vmem_limit_bytes=vmem_limit),
    )(xg)
    return stats.reshape(2, g, c).sum(axis=1)


# ------------------------- layer helpers -------------------------

def _bn_scale_shift(stats, count, gamma, beta, eps=1e-5):
    """Training-mode BatchNorm (batch statistics, biased variance)."""
    mean = stats[0] / count
    var = jnp.maximum(stats[1] / count - mean * mean, 0.0)
    scale = gamma / jnp.sqrt(var + eps)
    shift = beta - mean * scale
    return scale, shift


# ConvTranspose2d(k=4, s=2, p=1): output phase (ph, pw) collects taps
#   ph=0: (dh=0, kh=1), (dh=-1, kh=3);  ph=1: (dh=0, kh=2), (dh=+1, kh=0)
_TAPS = {0: ((0, 1), (-1, 3)), 1: ((0, 2), (1, 0))}


def _assemble_deconv(y, n, h, w, cout, bias=None, out_dtype=jnp.bfloat16):
    """Overlap-add for ConvTranspose2d(k=4, s=2, p=1) on the bf16 matmul out.

    y: (n*h*w, 16*cout) with column = kh*4*cout + kw*cout + co.
    Returns (n, 2h, 2w, cout) in `out_dtype` (bias added if given).
    XLA fuses this into a single pass over y (read bf16, write bf16/f32).
    """
    y6 = y.astype(jnp.float32).reshape(n, h, w, 4, 4, cout)
    yp = jnp.pad(y6, ((0, 0), (1, 1), (1, 1), (0, 0), (0, 0), (0, 0)))
    rows = []
    for ph in (0, 1):
        cols = []
        for pw in (0, 1):
            acc = None
            for dh, kh in _TAPS[ph]:
                for dw, kw in _TAPS[pw]:
                    piece = yp[:, 1 + dh:1 + dh + h, 1 + dw:1 + dw + w, kh, kw, :]
                    acc = piece if acc is None else acc + piece
            cols.append(acc)
        rows.append(jnp.stack(cols, axis=3))      # (n, h, w, 2, cout)
    out = jnp.stack(rows, axis=2).reshape(n, 2 * h, 2 * w, cout)
    if bias is not None:
        out = out + bias.reshape(1, 1, 1, cout)
    return out.astype(out_dtype)


# ------------------------- full decoder -------------------------

def init_params(key, stoch_dim, last_channels, original_in_channels,
                stem_channels, final_feature_width):
    keys = jax.random.split(key, 16)
    params = {}
    params['linear_w'] = 0.1 * jax.random.normal(
        keys[0], (stoch_dim, last_channels * final_feature_width ** 2), jnp.float32)
    params['bn0_gamma'] = jnp.ones((last_channels,), jnp.float32)
    params['bn0_beta'] = jnp.zeros((last_channels,), jnp.float32)
    deconvs = []
    ch = last_channels
    ki = 1
    while ch != stem_channels:
        w = 0.1 * jax.random.normal(keys[ki], (ch, ch // 2, 4, 4), jnp.float32)
        deconvs.append((w,
                        jnp.ones((ch // 2,), jnp.float32),
                        jnp.zeros((ch // 2,), jnp.float32)))
        ch //= 2
        ki += 1
    params['deconvs'] = deconvs
    w_last = 0.1 * jax.random.normal(keys[ki], (ch, original_in_channels, 4, 4),
                                     jnp.float32)
    b_last = 0.05 * jax.random.normal(keys[ki + 1], (original_in_channels,),
                                      jnp.float32)
    params['deconv_last'] = (w_last, b_last)
    return params


def decoder_forward(sample, params, cfg):
    """sample: (B, L, stoch_dim) -> (B, L, C_out, H_out, W_out)."""
    b, l, s = sample.shape
    c0, fw = cfg['last_channels'], cfg['final_feature_width']
    m0 = b * l

    # One-time weight reorder (constant-folded under jit): permute the Linear
    # weight columns (C,H,W)->(H,W,C) so the matmul output is directly NHWC
    # and no full-activation transpose is needed.
    w_lin = (params['linear_w'].reshape(s, c0, fw, fw)
             .transpose(0, 2, 3, 1).reshape(s, fw * fw * c0))

    # Linear (no bias) with fused per-column BN statistics.
    y0, colstats = pallas_matmul(sample.reshape(m0, s), w_lin, with_stats=True)
    ch_stats = colstats.reshape(2, fw * fw, c0).sum(axis=1)
    scale, shift = _bn_scale_shift(ch_stats, m0 * fw * fw,
                                   params['bn0_gamma'], params['bn0_beta'])

    n, h, wd, c = m0, fw, fw, c0
    x2d = y0.reshape(n * h * wd, c)          # contiguous reshape, no transpose

    # Upsampling stack: the previous layer's BN affine + ReLU is applied
    # inside this layer's matmul prologue (no standalone affine pass).
    for (wt, gamma, beta) in params['deconvs']:
        cin, cout = wt.shape[0], wt.shape[1]
        wmat = wt.transpose(0, 2, 3, 1).reshape(cin, 16 * cout)   # (kh,kw,co)
        y = pallas_matmul(x2d, wmat, scale=scale, shift=shift, relu=True)
        xf = _assemble_deconv(y, n, h, wd, cout, out_dtype=jnp.bfloat16)
        n, h, wd, c = xf.shape
        x2d = xf.reshape(n * h * wd, c)
        stats = pallas_bn_stats(x2d)
        scale, shift = _bn_scale_shift(stats, n * h * wd, gamma, beta)

    # Final deconv: previous BN affine + ReLU fused in; bias added inside the
    # fused overlap-add epilogue.
    w_last, b_last = params['deconv_last']
    cin, cout = w_last.shape[0], w_last.shape[1]
    wmat = w_last.transpose(0, 2, 3, 1).reshape(cin, 16 * cout)
    y = pallas_matmul(x2d, wmat, scale=scale, shift=shift, relu=True)
    xf = _assemble_deconv(y, n, h, wd, cout, bias=b_last, out_dtype=jnp.float32)
    n, h, wd, c = xf.shape

    # '(B L) H W C -> B L C H W'
    return xf.transpose(0, 3, 1, 2).reshape(b, l, c, h, wd)


# ------------------------- pure-JAX reference -------------------------

def _bn_ref(x2d, gamma, beta, eps=1e-5):
    mean = x2d.mean(0)
    var = x2d.var(0)
    return (x2d - mean) / jnp.sqrt(var + eps) * gamma + beta


def _conv_transpose_ref(x, w, bias=None):
    n, h, wd, cin = x.shape
    cout = w.shape[1]
    big = jnp.zeros((n, 2 * h + 2, 2 * wd + 2, cout), jnp.float32)
    for kh in range(4):
        for kw in range(4):
            contrib = jnp.einsum('nhwc,cd->nhwd', x, w[:, :, kh, kw])
            big = big.at[:, kh:kh + 2 * h:2, kw:kw + 2 * wd:2, :].add(contrib)
    out = big[:, 1:2 * h + 1, 1:2 * wd + 1, :]
    if bias is not None:
        out = out + bias
    return out


def decoder_ref(sample, params, cfg):
    b, l, s = sample.shape
    c0, fw = cfg['last_channels'], cfg['final_feature_width']
    x = sample.reshape(b * l, s) @ params['linear_w']
    x = x.reshape(b * l, c0, fw, fw).transpose(0, 2, 3, 1)
    n, h, wd, c = x.shape
    x = jnp.maximum(_bn_ref(x.reshape(-1, c), params['bn0_gamma'],
                            params['bn0_beta']), 0.0).reshape(n, h, wd, c)
    for (w, gamma, beta) in params['deconvs']:
        x = _conv_transpose_ref(x, w)
        n, h, wd, c = x.shape
        x = jnp.maximum(_bn_ref(x.reshape(-1, c), gamma, beta),
                        0.0).reshape(n, h, wd, c)
    w_last, b_last = params['deconv_last']
    x = _conv_transpose_ref(x, w_last, b_last)
    n, h, wd, c = x.shape
    return x.transpose(0, 3, 1, 2).reshape(b, l, c, h, wd)


if __name__ == "__main__":
    B, L = 2, 3
    stoch_dim = 32
    last_channels = 16
    stem_channels = 8
    original_in_channels = 3
    final_feature_width = 4

    key = jax.random.PRNGKey(0)
    kp, kx = jax.random.split(key)
    params = init_params(kp, stoch_dim, last_channels, original_in_channels,
                         stem_channels, final_feature_width)
    sample = jax.random.normal(kx, (B, L, stoch_dim), jnp.float32)
    cfg = dict(last_channels=last_channels,
               final_feature_width=final_feature_width)

    fwd = jax.jit(lambda smp, prm: decoder_forward(smp, prm, cfg))
    out = jax.block_until_ready(fwd(sample, params))

    # 16 -> 8 is one deconv stage; plus the final deconv: 4 -> 8 -> 16 spatial.
    expected_shape = (B, L, original_in_channels,
                      final_feature_width * 4, final_feature_width * 4)
    assert out.shape == expected_shape, out.shape
    assert bool(jnp.isfinite(out).all())

    ref = decoder_ref(sample, params, cfg)
    max_err = float(jnp.max(jnp.abs(out - ref)))
    assert max_err < 5e-2, f"max abs err {max_err}"

    print("KERNEL_OK")
</pallas_src>

<mosaic_0001>
module attributes {stable_mosaic.version = 11 : i64} {
  func.func @_mm_kernel(%arg0: i32, %arg1: i32, %arg2: memref<8x32xbf16, #tpu.memory_space<vmem>>, %arg3: memref<32x128xbf16, #tpu.memory_space<vmem>>, %arg4: memref<8x128xbf16, #tpu.memory_space<vmem>>, %arg5: memref<2x128xf32, #tpu.memory_space<vmem>>, %arg6: memref<2x128xf32, #tpu.memory_space<vmem>>) attributes {dimension_semantics = [#tpu.dimension_semantics<parallel>, #tpu.dimension_semantics<arbitrary>], iteration_bounds = array<i64: 2, 1>, scalar_prefetch = 0 : i64, scratch_operands = 1 : i64, tpu.core_type = #tpu.core_type<tc>, window_params = [{transform_indices = @transform_0, window_bounds = array<i64: 8, 32>}, {transform_indices = @transform_1, window_bounds = array<i64: 32, 128>}, {transform_indices = @transform_2, window_bounds = array<i64: 8, 128>}, {transform_indices = @transform_3, window_bounds = array<i64: 2, 128>}]} {
    %c0 = arith.constant 0 : index
    %c0_0 = arith.constant 0 : index
    %0 = vector.load %arg2[%c0, %c0_0] : memref<8x32xbf16, #tpu.memory_space<vmem>>, vector<8x32xbf16>
    %c0_1 = arith.constant 0 : index
    %c0_2 = arith.constant 0 : index
    %1 = vector.load %arg3[%c0_1, %c0_2] : memref<32x128xbf16, #tpu.memory_space<vmem>>, vector<32x128xbf16>
    %cst = arith.constant dense<0.000000e+00> : vector<8x128xf32>
    %2 = tpu.matmul %0, %1, %cst {dimension_numbers = #tpu.dot_dimension_numbers<[1], [0], [0], [1], [0, 0, 1, 1], [], []>} : vector<8x32xbf16>, vector<32x128xbf16>, vector<8x128xf32> -> vector<8x128xf32>
    %3 = arith.truncf %2 : vector<8x128xf32> to vector<8x128xbf16>
    %c0_3 = arith.constant 0 : index
    %c0_4 = arith.constant 0 : index
    %4 = vector.load %arg4[%c0_3, %c0_4] : memref<8x128xbf16, #tpu.memory_space<vmem>>, vector<8x128xbf16>
    tpu.vector_store %arg4[%c0_3, %c0_4], %3 {strides = array<i32>} : memref<8x128xbf16, #tpu.memory_space<vmem>>, vector<8x128xbf16>,
    %c0_i32 = arith.constant 0 : i32
    %5 = arith.cmpi eq, %arg1, %c0_i32 : i32
    %6 = arith.extui %5 : i1 to i32
    %c0_i32_5 = arith.constant 0 : i32
    %7 = arith.cmpi ne, %6, %c0_i32_5 : i32
    scf.if %7 {
      %cst_17 = arith.constant 0.000000e+00 : f32
      %22 = vector.broadcast %cst_17 : f32 to vector<2x128xf32>
      %c0_18 = arith.constant 0 : index
      %c0_19 = arith.constant 0 : index
      %23 = vector.load %arg6[%c0_18, %c0_19] : memref<2x128xf32, #tpu.memory_space<vmem>>, vector<2x128xf32>
      tpu.vector_store %arg6[%c0_18, %c0_19], %22 {strides = array<i32>} : memref<2x128xf32, #tpu.memory_space<vmem>>, vector<2x128xf32>,
    } else {
    }
    %c0_6 = arith.constant 0 : index
    %c0_7 = arith.constant 0 : index
    %8 = vector.load %arg6[%c0_6, %c0_7] : memref<2x128xf32, #tpu.memory_space<vmem>>, vector<1x128xf32>
    %cst_8 = arith.constant dense<0.000000e+00> : vector<128xf32>
    %9 = vector.multi_reduction <add>, %2, %cst_8 [0] : vector<8x128xf32> to vector<128xf32>
    %10 = vector.shape_cast %9 : vector<128xf32> to vector<1x128xf32>
    %11 = arith.addf %8, %10 : vector<1x128xf32>
    %c0_9 = arith.constant 0 : index
    %c0_10 = arith.constant 0 : index
    %12 = vector.load %arg6[%c0_9, %c0_10] : memref<2x128xf32, #tpu.memory_space<vmem>>, vector<1x128xf32>
    tpu.vector_store %arg6[%c0_9, %c0_10], %11 {strides = array<i32>} : memref<2x128xf32, #tpu.memory_space<vmem>>, vector<1x128xf32>,
    %c1 = arith.constant 1 : index
    %c0_11 = arith.constant 0 : index
    %13 = vector.load %arg6[%c1, %c0_11] : memref<2x128xf32, #tpu.memory_space<vmem>>, vector<1x128xf32>
    %14 = arith.mulf %2, %2 : vector<8x128xf32>
    %cst_12 = arith.constant dense<0.000000e+00> : vector<128xf32>
    %15 = vector.multi_reduction <add>, %14, %cst_12 [0] : vector<8x128xf32> to vector<128xf32>
    %16 = vector.shape_cast %15 : vector<128xf32> to vector<1x128xf32>
    %17 = arith.addf %13, %16 : vector<1x128xf32>
    %c1_13 = arith.constant 1 : index
    %c0_14 = arith.constant 0 : index
    %18 = vector.load %arg6[%c1_13, %c0_14] : memref<2x128xf32, #tpu.memory_space<vmem>>, vector<1x128xf32>
    tpu.vector_store %arg6[%c1_13, %c0_14], %17 {strides = array<i32>} : memref<2x128xf32, #tpu.memory_space<vmem>>, vector<1x128xf32>,
    %c0_i32_15 = arith.constant 0 : i32
    %19 = arith.cmpi eq, %arg1, %c0_i32_15 : i32
    %20 = arith.extui %19 : i1 to i32
    %c0_i32_16 = arith.constant 0 : i32
    %21 = arith.cmpi ne, %20, %c0_i32_16 : i32
    scf.if %21 {
      %c0_17 = arith.constant 0 : index
      %c0_18 = arith.constant 0 : index
      %22 = vector.load %arg6[%c0_17, %c0_18] : memref<2x128xf32, #tpu.memory_space<vmem>>, vector<2x128xf32>
      %c0_19 = arith.constant 0 : index
      %c0_20 = arith.constant 0 : index
      %23 = vector.load %arg5[%c0_19, %c0_20] : memref<2x128xf32, #tpu.memory_space<vmem>>, vector<2x128xf32>
      tpu.vector_store %arg5[%c0_19, %c0_20], %22 {strides = array<i32>} : memref<2x128xf32, #tpu.memory_space<vmem>>, vector<2x128xf32>,
    } else {
    }
    return
  }
  func.func @transform_0(%arg0: i32, %arg1: i32) -> (i32, i32) {
    %c0_i32 = arith.constant 0 : i32
    %c0_i32_0 = arith.constant 0 : i32
    return %arg1, %c0_i32 : i32, i32
  }
  func.func @transform_1(%arg0: i32, %arg1: i32) -> (i32, i32) {
    %c0_i32 = arith.constant 0 : i32
    %c0_i32_0 = arith.constant 0 : i32
    return %c0_i32, %arg0 : i32, i32
  }
  func.func @transform_2(%arg0: i32, %arg1: i32) -> (i32, i32) {
    %c0_i32 = arith.constant 0 : i32
    return %arg1, %arg0 : i32, i32
  }
  func.func @transform_3(%arg0: i32, %arg1: i32) -> (i32, i32) {
    %c0_i32 = arith.constant 0 : i32
    %c0_i32_0 = arith.constant 0 : i32
    return %c0_i32, %arg0 : i32, i32
  }
}

module attributes {stable_mosaic.version = 11 : i64} {
  func.func @_mm_kernel(%arg0: i32, %arg1: i32, %arg2: memref<48x16xbf16, #tpu.memory_space<vmem>>, %arg3: memref<1x16xf32, #tpu.memory_space<vmem>>, %arg4: memref<1x16xf32, #tpu.memory_space<vmem>>, %arg5: memref<16x128xbf16, #tpu.memory_space<vmem>>, %arg6: memref<48x128xbf16, #tpu.memory_space<vmem>>) attributes {dimension_semantics = [#tpu.dimension_semantics<parallel>, #tpu.dimension_semantics<parallel>], iteration_bounds = array<i64: 2, 1>, scalar_prefetch = 0 : i64, scratch_operands = 0 : i64, tpu.core_type = #tpu.core_type<tc>, window_params = [{transform_indices = @transform_0, window_bounds = array<i64: 48, 16>}, {pipeline_mode = #tpu.pipeline_mode<synchronous>, transform_indices = @transform_1, window_bounds = array<i64: 1, 16>}, {pipeline_mode = #tpu.pipeline_mode<synchronous>, transform_indices = @transform_2, window_bounds = array<i64: 1, 16>}, {transform_indices = @transform_3, window_bounds = array<i64: 16, 128>}, {transform_indices = @transform_4, window_bounds = array<i64: 48, 128>}]} {
    %c0 = arith.constant 0 : index
    %c0_0 = arith.constant 0 : index
    %0 = vector.load %arg2[%c0, %c0_0] : memref<48x16xbf16, #tpu.memory_space<vmem>>, vector<48x16xbf16>
    %1 = arith.extf %0 : vector<48x16xbf16> to vector<48x16xf32>
    %c0_1 = arith.constant 0 : index
    %c0_2 = arith.constant 0 : index
    %2 = vector.load %arg3[%c0_1, %c0_2] : memref<1x16xf32, #tpu.memory_space<vmem>>, vector<1x16xf32>
    %3 = vector.broadcast %2 : vector<1x16xf32> to vector<48x16xf32>
    %4 = arith.mulf %1, %3 : vector<48x16xf32>
    %c0_3 = arith.constant 0 : index
    %c0_4 = arith.constant 0 : index
    %5 = vector.load %arg4[%c0_3, %c0_4] : memref<1x16xf32, #tpu.memory_space<vmem>>, vector<1x16xf32>
    %6 = vector.broadcast %5 : vector<1x16xf32> to vector<48x16xf32>
    %7 = arith.addf %4, %6 : vector<48x16xf32>
    %cst = arith.constant 0.000000e+00 : f32
    %8 = vector.broadcast %cst : f32 to vector<48x16xf32>
    %9 = arith.maximumf %7, %8 : vector<48x16xf32>
    %10 = arith.truncf %9 : vector<48x16xf32> to vector<48x16xbf16>
    %c0_5 = arith.constant 0 : index
    %c0_6 = arith.constant 0 : index
    %11 = vector.load %arg5[%c0_5, %c0_6] : memref<16x128xbf16, #tpu.memory_space<vmem>>, vector<16x128xbf16>
    %cst_7 = arith.constant dense<0.000000e+00> : vector<48x128xf32>
    %12 = tpu.matmul %10, %11, %cst_7 {dimension_numbers = #tpu.dot_dimension_numbers<[1], [0], [0], [1], [0, 0, 1, 1], [], []>} : vector<48x16xbf16>, vector<16x128xbf16>, vector<48x128xf32> -> vector<48x128xf32>
    %13 = arith.truncf %12 : vector<48x128xf32> to vector<48x128xbf16>
    %c0_8 = arith.constant 0 : index
    %c0_9 = arith.constant 0 : index
    %14 = vector.load %arg6[%c0_8, %c0_9] : memref<48x128xbf16, #tpu.memory_space<vmem>>, vector<48x128xbf16>
    tpu.vector_store %arg6[%c0_8, %c0_9], %13 {strides = array<i32>} : memref<48x128xbf16, #tpu.memory_space<vmem>>, vector<48x128xbf16>,
    return
  }
  func.func @transform_0(%arg0: i32, %arg1: i32) -> (i32, i32) {
    %c0_i32 = arith.constant 0 : i32
    %c0_i32_0 = arith.constant 0 : i32
    return %arg0, %c0_i32 : i32, i32
  }
  func.func @transform_1(%arg0: i32, %arg1: i32) -> (i32, i32) {
    %c0_i32 = arith.constant 0 : i32
    %c0_i32_0 = arith.constant 0 : i32
    %c0_i32_1 = arith.constant 0 : i32
    return %c0_i32, %c0_i32_0 : i32, i32
  }
  func.func @transform_2(%arg0: i32, %arg1: i32) -> (i32, i32) {
    %c0_i32 = arith.constant 0 : i32
    %c0_i32_0 = arith.constant 0 : i32
    %c0_i32_1 = arith.constant 0 : i32
    return %c0_i32, %c0_i32_0 : i32, i32
  }
  func.func @transform_3(%arg0: i32, %arg1: i32) -> (i32, i32) {
    %c0_i32 = arith.constant 0 : i32
    %c0_i32_0 = arith.constant 0 : i32
    return %c0_i32, %arg1 : i32, i32
  }
  func.func @transform_4(%arg0: i32, %arg1: i32) -> (i32, i32) {
    %c0_i32 = arith.constant 0 : i32
    return %arg0, %arg1 : i32, i32
  }
}

module attributes {stable_mosaic.version = 11 : i64} {
  func.func @_stats_kernel(%arg0: i32, %arg1: memref<24x128xbf16, #tpu.memory_space<vmem>>, %arg2: memref<2x128xf32, #tpu.memory_space<vmem>>, %arg3: memref<2x128xf32, #tpu.memory_space<vmem>>) attributes {dimension_semantics = [#tpu.dimension_semantics<arbitrary>], iteration_bounds = array<i64: 1>, scalar_prefetch = 0 : i64, scratch_operands = 1 : i64, tpu.core_type = #tpu.core_type<tc>, window_params = [{transform_indices = @transform_0, window_bounds = array<i64: 24, 128>}, {pipeline_mode = #tpu.pipeline_mode<synchronous>, transform_indices = @transform_1, window_bounds = array<i64: 2, 128>}]} {
    %c0_i32 = arith.constant 0 : i32
    %0 = arith.cmpi eq, %arg0, %c0_i32 : i32
    %1 = arith.extui %0 : i1 to i32
    %c0_i32_0 = arith.constant 0 : i32
    %2 = arith.cmpi ne, %1, %c0_i32_0 : i32
    scf.if %2 {
      %cst_12 = arith.constant 0.000000e+00 : f32
      %19 = vector.broadcast %cst_12 : f32 to vector<2x128xf32>
      %c0_13 = arith.constant 0 : index
      %c0_14 = arith.constant 0 : index
      %20 = vector.load %arg3[%c0_13, %c0_14] : memref<2x128xf32, #tpu.memory_space<vmem>>, vector<2x128xf32>
      tpu.vector_store %arg3[%c0_13, %c0_14], %19 {strides = array<i32>} : memref<2x128xf32, #tpu.memory_space<vmem>>, vector<2x128xf32>,
    } else {
    }
    %c0 = arith.constant 0 : index
    %c0_1 = arith.constant 0 : index
    %3 = vector.load %arg1[%c0, %c0_1] : memref<24x128xbf16, #tpu.memory_space<vmem>>, vector<24x128xbf16>
    %4 = arith.extf %3 : vector<24x128xbf16> to vector<24x128xf32>
    %c0_2 = arith.constant 0 : index
    %c0_3 = arith.constant 0 : index
    %5 = vector.load %arg3[%c0_2, %c0_3] : memref<2x128xf32, #tpu.memory_space<vmem>>, vector<1x128xf32>
    %cst = arith.constant dense<0.000000e+00> : vector<128xf32>
    %6 = vector.multi_reduction <add>, %4, %cst [0] : vector<24x128xf32> to vector<128xf32>
    %7 = vector.shape_cast %6 : vector<128xf32> to vector<1x128xf32>
    %8 = arith.addf %5, %7 : vector<1x128xf32>
    %c0_4 = arith.constant 0 : index
    %c0_5 = arith.constant 0 : index
    %9 = vector.load %arg3[%c0_4, %c0_5] : memref<2x128xf32, #tpu.memory_space<vmem>>, vector<1x128xf32>
    tpu.vector_store %arg3[%c0_4, %c0_5], %8 {strides = array<i32>} : memref<2x128xf32, #tpu.memory_space<vmem>>, vector<1x128xf32>,
    %c1 = arith.constant 1 : index
    %c0_6 = arith.constant 0 : index
    %10 = vector.load %arg3[%c1, %c0_6] : memref<2x128xf32, #tpu.memory_space<vmem>>, vector<1x128xf32>
    %11 = arith.mulf %4, %4 : vector<24x128xf32>
    %cst_7 = arith.constant dense<0.000000e+00> : vector<128xf32>
    %12 = vector.multi_reduction <add>, %11, %cst_7 [0] : vector<24x128xf32> to vector<128xf32>
    %13 = vector.shape_cast %12 : vector<128xf32> to vector<1x128xf32>
    %14 = arith.addf %10, %13 : vector<1x128xf32>
    %c1_8 = arith.constant 1 : index
    %c0_9 = arith.constant 0 : index
    %15 = vector.load %arg3[%c1_8, %c0_9] : memref<2x128xf32, #tpu.memory_space<vmem>>, vector<1x128xf32>
    tpu.vector_store %arg3[%c1_8, %c0_9], %14 {strides = array<i32>} : memref<2x128xf32, #tpu.memory_space<vmem>>, vector<1x128xf32>,
    %c0_i32_10 = arith.constant 0 : i32
    %16 = arith.cmpi eq, %arg0, %c0_i32_10 : i32
    %17 = arith.extui %16 : i1 to i32
    %c0_i32_11 = arith.constant 0 : i32
    %18 = arith.cmpi ne, %17, %c0_i32_11 : i32
    scf.if %18 {
      %c0_12 = arith.constant 0 : index
      %c0_13 = arith.constant 0 : index
      %19 = vector.load %arg3[%c0_12, %c0_13] : memref<2x128xf32, #tpu.memory_space<vmem>>, vector<2x128xf32>
      %c0_14 = arith.constant 0 : index
      %c0_15 = arith.constant 0 : index
      %20 = vector.load %arg2[%c0_14, %c0_15] : memref<2x128xf32, #tpu.memory_space<vmem>>, vector<2x128xf32>
      tpu.vector_store %arg2[%c0_14, %c0_15], %19 {strides = array<i32>} : memref<2x128xf32, #tpu.memory_space<vmem>>, vector<2x128xf32>,
    } else {
    }
    return
  }
  func.func @transform_0(%arg0: i32) -> (i32, i32) {
    %c0_i32 = arith.constant 0 : i32
    %c0_i32_0 = arith.constant 0 : i32
    return %arg0, %c0_i32 : i32, i32
  }
  func.func @transform_1(%arg0: i32) -> (i32, i32) {
    %c0_i32 = arith.constant 0 : i32
    %c0_i32_0 = arith.constant 0 : i32
    %c0_i32_1 = arith.constant 0 : i32
    return %c0_i32, %c0_i32_0 : i32, i32
  }
}

module attributes {stable_mosaic.version = 11 : i64} {
  func.func @_mm_kernel(%arg0: i32, %arg1: i32, %arg2: memref<192x8xbf16, #tpu.memory_space<vmem>>, %arg3: memref<1x8xf32, #tpu.memory_space<vmem>>, %arg4: memref<1x8xf32, #tpu.memory_space<vmem>>, %arg5: memref<8x128xbf16, #tpu.memory_space<vmem>>, %arg6: memref<192x128xbf16, #tpu.memory_space<vmem>>) attributes {dimension_semantics = [#tpu.dimension_semantics<parallel>, #tpu.dimension_semantics<parallel>], iteration_bounds = array<i64: 2, 1>, scalar_prefetch = 0 : i64, scratch_operands = 0 : i64, tpu.core_type = #tpu.core_type<tc>, window_params = [{transform_indices = @transform_0, window_bounds = array<i64: 192, 8>}, {pipeline_mode = #tpu.pipeline_mode<synchronous>, transform_indices = @transform_1, window_bounds = array<i64: 1, 8>}, {pipeline_mode = #tpu.pipeline_mode<synchronous>, transform_indices = @transform_2, window_bounds = array<i64: 1, 8>}, {transform_indices = @transform_3, window_bounds = array<i64: 8, 128>}, {transform_indices = @transform_4, window_bounds = array<i64: 192, 128>}]} {
    %c0 = arith.constant 0 : index
    %c0_0 = arith.constant 0 : index
    %0 = vector.load %arg2[%c0, %c0_0] : memref<192x8xbf16, #tpu.memory_space<vmem>>, vector<192x8xbf16>
    %1 = arith.extf %0 : vector<192x8xbf16> to vector<192x8xf32>
    %c0_1 = arith.constant 0 : index
    %c0_2 = arith.constant 0 : index
    %2 = vector.load %arg3[%c0_1, %c0_2] : memref<1x8xf32, #tpu.memory_space<vmem>>, vector<1x8xf32>
    %3 = vector.broadcast %2 : vector<1x8xf32> to vector<192x8xf32>
    %4 = arith.mulf %1, %3 : vector<192x8xf32>
    %c0_3 = arith.constant 0 : index
    %c0_4 = arith.constant 0 : index
    %5 = vector.load %arg4[%c0_3, %c0_4] : memref<1x8xf32, #tpu.memory_space<vmem>>, vector<1x8xf32>
    %6 = vector.broadcast %5 : vector<1x8xf32> to vector<192x8xf32>
    %7 = arith.addf %4, %6 : vector<192x8xf32>
    %cst = arith.constant 0.000000e+00 : f32
    %8 = vector.broadcast %cst : f32 to vector<192x8xf32>
    %9 = arith.maximumf %7, %8 : vector<192x8xf32>
    %10 = arith.truncf %9 : vector<192x8xf32> to vector<192x8xbf16>
    %c0_5 = arith.constant 0 : index
    %c0_6 = arith.constant 0 : index
    %11 = vector.load %arg5[%c0_5, %c0_6] : memref<8x128xbf16, #tpu.memory_space<vmem>>, vector<8x128xbf16>
    %cst_7 = arith.constant dense<0.000000e+00> : vector<192x128xf32>
    %12 = tpu.matmul %10, %11, %cst_7 {dimension_numbers = #tpu.dot_dimension_numbers<[1], [0], [0], [1], [0, 0, 1, 1], [], []>} : vector<192x8xbf16>, vector<8x128xbf16>, vector<192x128xf32> -> vector<192x128xf32>
    %13 = arith.truncf %12 : vector<192x128xf32> to vector<192x128xbf16>
    %c0_8 = arith.constant 0 : index
    %c0_9 = arith.constant 0 : index
    %14 = vector.load %arg6[%c0_8, %c0_9] : memref<192x128xbf16, #tpu.memory_space<vmem>>, vector<192x128xbf16>
    tpu.vector_store %arg6[%c0_8, %c0_9], %13 {strides = array<i32>} : memref<192x128xbf16, #tpu.memory_space<vmem>>, vector<192x128xbf16>,
    return
  }
  func.func @transform_0(%arg0: i32, %arg1: i32) -> (i32, i32) {
    %c0_i32 = arith.constant 0 : i32
    %c0_i32_0 = arith.constant 0 : i32
    return %arg0, %c0_i32 : i32, i32
  }
  func.func @transform_1(%arg0: i32, %arg1: i32) -> (i32, i32) {
    %c0_i32 = arith.constant 0 : i32
    %c0_i32_0 = arith.constant 0 : i32
    %c0_i32_1 = arith.constant 0 : i32
    return %c0_i32, %c0_i32_0 : i32, i32
  }
  func.func @transform_2(%arg0: i32, %arg1: i32) -> (i32, i32) {
    %c0_i32 = arith.constant 0 : i32
    %c0_i32_0 = arith.constant 0 : i32
    %c0_i32_1 = arith.constant 0 : i32
    return %c0_i32, %c0_i32_0 : i32, i32
  }
  func.func @transform_3(%arg0: i32, %arg1: i32) -> (i32, i32) {
    %c0_i32 = arith.constant 0 : i32
    %c0_i32_0 = arith.constant 0 : i32
    return %c0_i32, %arg1 : i32, i32
  }
  func.func @transform_4(%arg0: i32, %arg1: i32) -> (i32, i32) {
    %c0_i32 = arith.constant 0 : i32
    return %arg0, %arg1 : i32, i32
  }
}

</mosaic_0001>

<bundles_post_ra>
// kernel: _lambda_.5
= control target key start
LH: loop header
LB: loop body
LE: loop exit
PB: predicated region body
PF: predicated region fallthrough
CT: control target
= control target key end

     0   :  { %s638_s15 = smov 0   ;;  %s640_s16 = smov 0   ;;  %s690_s0 = inlined_call_operand.vmem [shape: bf16[96,16], index: 0, kind: input, shape index: {}]   ;;  %s691_s1 = inlined_call_operand.vmem [shape: f32[1,16], index: 1, kind: input, shape index: {}]   ;;  %s692_s2 = inlined_call_operand.vmem [shape: f32[1,16], index: 2, kind: input, shape index: {}]   ;;  %s693_s3 = inlined_call_operand.vmem [shape: bf16[16,128], index: 3, kind: input, shape index: {}]   ;;  %s694_s4 = inlined_call_operand.vmem [shape: bf16[96,128], index: 4, kind: output, shape index: {}]  }
   0x1   :  { %s642_s17 = smov 0  }
   0x2 LB: > { %s26_s18 = sadd.s32 1, %s605_s16  ;;  %p486_p0 = scmp.ge.s32.totalorder %s609_s17, 1  ;;  %s609_s17 = sphi %s642_s17, %s14_s17   ;;  %s605_s16 = sphi %s640_s16, %s696_s16   ;;  %s601_s15 = sphi %s638_s15, %s695_s15  }
   0x3   : > { %p28_p1 = scmp.ge.s32.totalorder %s26_s18, 2  ;;  %p186_p2 = scmp.lt.s32.totalorder %s609_s17, 3 }
   0x5   : > { %s698_s18 = smov (%p28_p1, %s26_s18), 0  ;;  %p187_p3 = pnand %p486_p0, %p186_p2 }
   0x6   : > { %s219_s21 = smul.u32 (!%p187_p3), 6, %s601_s15 }
   0x7   : > { %190 = sbr.rel (%p187_p3) target bundleno = 234 (0xea), region = 36 }
   0x8   : > { %p220_p4 = scmp.lt.s32.totalorder (!%p187_p3), %s219_s21, 11 }
   0xc   : > { %v586_v0 = vld [vmem:[%s693_s3] sm:$0xff]   ;;  %v611_v1 = vmov 0.0   ;;  %vm612_vm0 = vmmov 0   ;;  %s700_s21 = smov (!%p220_p4, %s219_s21), 11  ;;  %vm294_vm1 = vcmask 130048  }
   0xd   : > { %558 = vmatprep.subr.bf16.mxu1 %v611_v1  ;;  %544 = vmatprep.subr.bf16.mxu0 %v611_v1  ;;  %s487_s22 = sshll.u32 %s700_s21, 2  ;;  %v489_v2 = vld [vmem:[%s691_s1] ss:$0 sm:$0xff] }
   0xe   : > { %559 = vmatpush3.bf16.msra.mxu1 %v586_v0  ;;  %545 = vmatpush3.bf16.msra.mxu0 %v586_v0  ;;  %s223_s25 = scalar_lea.vmem %s690_s0, %s487_s22  ;;  %v490_v10 = vld [vmem:[%s692_s2] ss:$0 sm:$0xff]  ;;  %s236_s6 = scalar_lea.vmem %s694_s4, %s487_s22 }
   0xf   : > { %550 = vmatprep.mubr.msk.bf16.mxu1 %vm612_vm0, %v611_v1  ;;  %546 = vmatprep.mubr.msk.bf16.mxu0 %vm612_vm0, %v611_v1  ;;  %v536_v3 = vld [vmem:[%s223_s25 + $0x8] sm:$0xff]   ;;  %v510_v4 = vld [vmem:[%s223_s25] sm:$0xff]   ;;  %v537_v5 = vld [vmem:[%s223_s25 + $0x10] sm:$0xff]  }
  0x10   : > { %v515_v6 = vunpack.c.l.bf16 %v536_v3  ;;  %v516_v7 = vunpack.c.h.bf16 %v536_v3  ;;  %v511_v8 = vunpack.c.l.bf16 %v510_v4  ;;  %v512_v9 = vunpack.c.h.bf16 %v510_v4 }
  0x11   : > { %v519_v11 = vunpack.c.l.bf16 %v537_v5  ;;  %v520_v12 = vunpack.c.h.bf16 %v537_v5 }
  0x12   : > { %v260_v13 = vmul.f32 %v515_v6, %v489_v2  ;;  %v261_v14 = vmul.f32 %v516_v7, %v489_v2  ;;  %v258_v15 = vmul.f32 %v511_v8, %v489_v2  ;;  %v259_v16 = vmul.f32 %v512_v9, %v489_v2 }
  0x13   : > { %v262_v17 = vmul.f32 %v519_v11, %v489_v2  ;;  %v263_v18 = vmul.f32 %v520_v12, %v489_v2 }
  0x14   : > { %v273_v19 = vadd.f32 %v490_v10, %v260_v13  ;;  %v274_v20 = vadd.f32 %v490_v10, %v261_v14  ;;  %v271_v21 = vadd.f32 %v490_v10, %v258_v15  ;;  %v272_v22 = vadd.f32 %v490_v10, %v259_v16 }
  0x15   : > { %v275_v23 = vadd.f32 %v490_v10, %v262_v17  ;;  %v276_v24 = vadd.f32 %v490_v10, %v263_v18 }
  0x16   : > { %v279_v25 = vmax.f32 %v273_v19, 0.0  ;;  %v280_v26 = vmax.f32 %v274_v20, 0.0  ;;  %v277_v27 = vmax.f32 %v271_v21, 0.0  ;;  %v278_v28 = vmax.f32 %v272_v22, 0.0 }
  0x17   : > { %v281_v31 = vmax.f32 %v275_v23, 0.0  ;;  %v282_v32 = vmax.f32 %v276_v24, 0.0 }
  0x18   : > { %v284_v29 = vpack.c.bf16 %v280_v26, %v279_v25  ;;  %v283_v30 = vpack.c.bf16 %v278_v28, %v277_v27 }
  0x19   : > { %v285_v33 = vpack.c.bf16 %v282_v32, %v281_v31 }
  0x1a   : > { %551 = vmatmul.mubr.msk.bf16.vlgmr.msra.gmra.mxu1 %vm294_vm1, %v284_v29  ;;  %547 = vmatmul.mubr.msk.bf16.vlgmr.msra.gmra.mxu0 %vm294_vm1, %v283_v30 }
  0x1b   : > { %554 = vmatprep.mubr.msk.bf16.mxu1 %vm612_vm0, %v611_v1 }
  0x22   : > { %555 = vmatmul.mubr.msk.bf16.gmra.mxu1 %vm294_vm1, %v285_v33 }
  0xda   : > { %v346_v34 = vpop.f32.mrf.mxu1  ;;  %v338_v35 = vpop.f32.mrf.mxu0 }
  0xdc   : > { %v552_v36 = vpop.f32.mrf.mxu1  ;;  %v548_v37 = vpop.f32.mrf.mxu0 }
  0xde   : > { %v349_v38 = vpop.f32.mrf.mxu1  ;;  %v341_v39 = vpop.f32.mrf.mxu0 }
  0xdf   : > { %v529_v40 = vpack.c.bf16 %v349_v38, %v346_v34  ;;  %v524_v41 = vpack.c.bf16 %v341_v39, %v338_v35 }
  0xe0   : > { %v553_v42 = vpop.f32.mrf.mxu1  ;;  %v549_v43 = vpop.f32.mrf.mxu0 }
  0xe1   : > { %538 = vst [vmem:[%s236_s6 + $0x8] sm:$0xff] %v529_v40   ;;  %525 = vst [vmem:[%s236_s6] sm:$0xff] %v524_v41  }
  0xe2   : > { %v354_v44 = vpop.f32.mrf.mxu1 }
  0xe4   : > { %v556_v45 = vpop.f32.mrf.mxu1 }
  0xe6   : > { %v357_v46 = vpop.f32.mrf.mxu1 }
  0xe7   : > { %v534_v47 = vpack.c.bf16 %v357_v46, %v354_v44 }
  0xe8   : > { %v557_v48 = vpop.f32.mrf.mxu1 }
  0xe9   : > { %539 = vst [vmem:[%s236_s6 + $0x10] sm:$0xff] %v534_v47  }
  0xea PF: > { %s14_s17 = sadd.s32 1, %s609_s17   ;;  %s695_s15 = smov %s605_s16 }
  0xeb   : > { %p11_p5 = scmp.ge.s32.totalorder %s14_s17, 4   ;;  %s696_s16 = smov %s698_s18 }
  0xed   :  { %13 = sbr.rel (!%p11_p5) target bundleno = 2 (0x2), region = 69 }

// kernel: _lambda_.4
= control target key start
LH: loop header
LB: loop body
LE: loop exit
PB: predicated region body
PF: predicated region fallthrough
CT: control target
= control target key end

     0   :  { %s630_s12 = smov 0   ;;  %s632_s13 = smov 0   ;;  %s706_s0 = inlined_call_operand.vmem [shape: bf16[8,32], index: 0, kind: input, shape index: {}]   ;;  %s707_s1 = inlined_call_operand.vmem [shape: bf16[32,256], index: 1, kind: input, shape index: {}]   ;;  %s708_s2 = inlined_call_operand.vmem [shape: bf16[8,256], index: 2, kind: output, shape index: {0}]   ;;  %s709_s3 = inlined_call_operand.vmem [shape: f32[2,256], index: 3, kind: output, shape index: {1}]  }
   0x1   :  { %s634_s14 = smov 0   ;;  %s636_s15 = smov 0  }
   0x2   :  { %s638_s16 = smov 0  }
   0x3 LB: > { %s26_s17 = sadd.s32 1, %s602_s15  ;;  %p66_p1 = scmp.ne.s32.totalorder %s594_s13, %s590_s12  ;;  %s606_s16 = sphi %s638_s16, %s14_s16   ;;  %s602_s15 = sphi %s636_s15, %s713_s15   ;;  %s598_s14 = sphi %s634_s14, %s712_s14   ;;  %s594_s13 = sphi %s632_s13, %s711_s13   ;;  %s590_s12 = sphi %s630_s12, %s710_s12  }
   0x4   : > { %p28_p0 = scmp.ge.s32.totalorder %s26_s17, 2  ;;  %p67_p2 = scmp.eq.s32.totalorder %s606_s16, 0 }
   0x5   : > { %s59_s19 = sadd.s32 1, %s594_s13  ;;  %p501_p5 = scmp.ge.s32.totalorder %s606_s16, 2 }
   0x6   : > { %s715_s17 = smov (%p28_p0, %s26_s17), 0  ;;  %p68_p3 = por %p67_p2, %p66_p1 }
   0x7   : > { %s56_s18 = ssub.s32 %s602_s15, %s715_s17  ;;  %153 = sbr.rel (%p501_p5) target bundleno = 18 (0x12), region = 20 }
   0x8   : > { %p57_p4 = scmp.eq.s32.totalorder %s56_s18, 0 }
   0xa   : > { %s665_s20 = scalar_select %p57_p4, %s594_s13, %s59_s19  }
   0xc   : > { %156 = sbr.rel (!%p68_p3) target bundleno = 18 (0x12), region = 24  ;;  %s158_s21 = sand.u32 (%p68_p3), 1, %s594_s13  }
   0xd   : > { %s503_s22 = sshll.u32 (%p68_p3), %s602_s15, 2  ;;  %s502_s23 = sshll.u32 (%p68_p3), %s158_s21, 4 }
   0xe   : > { %s162_s26 = scalar_lea.vmem (%p68_p3), %s707_s1, %s503_s22  ;;  %s160_s27 = scalar_lea.vmem (%p68_p3), [#allocation3], %s502_s23 }
   0xf   : > { %v179_v0 = vld [vmem:[%s162_s26] sm:$0xf] (%p68_p3)  ;;  %v181_v1 = vld [vmem:[%s162_s26 + $0x8] sm:$0xf] (%p68_p3)  ;;  %v183_v2 = vld [vmem:[%s162_s26 + $0x10] sm:$0xf] (%p68_p3) }
  0x10   : > { %180 = vst [vmem:[%s160_s27] sm:$0xf] (%p68_p3), %v179_v0  ;;  %182 = vst [vmem:[%s160_s27 + $0x4] sm:$0xf] (%p68_p3), %v181_v1  ;;  %v185_v3 = vld [vmem:[%s162_s26 + $0x18] sm:$0xf] (%p68_p3) }
  0x11   : > { %184 = vst [vmem:[%s160_s27 + $0x8] sm:$0xf] %v183_v2  ;;  %186 = vst [vmem:[%s160_s27 + $0xc] sm:$0xf] %v185_v3 }
  0x12 PF: > { %p504_p6 = scmp.ge.s32.totalorder %s606_s16, 1  ;;  %p217_p7 = scmp.lt.s32.totalorder %s606_s16, 3 }
  0x14   : > { %p218_p8 = pnand %p504_p6, %p217_p7 }
  0x15   : > { %s224_s28 = sand.u32 (!%p218_p8), 1, %s590_s12   ;;  %p264_p9 = scmp.lt.s32.totalorder (!%p218_p8), %s598_s14, 1 }
  0x16   : > { %221 = sbr.rel (%p218_p8) target bundleno = 254 (0xfe), region = 65  ;;  %s505_s29 = sshll.u32 (!%p218_p8), %s224_s28, 4 }
  0x17   : > { %s226_s30 = scalar_lea.vmem (!%p218_p8), [#allocation3], %s505_s29 }
  0x1b   : > { %v608_v4 = vmov 0.0   ;;  %vm609_vm0 = vmmov 0   ;;  %v566_v5 = vld [vmem:[%s226_s30 + $0x8] sm:$0xff]   ;;  %v567_v6 = vld [vmem:[%s226_s30] sm:$0xff]   ;;  %vm292_vm1 = vcmask 261120   ;;  %s717_s14 = smov (!%p264_p9, %s598_s14), 1 }
  0x1c   : > { %516 = vmatprep.subr.bf16.mxu0 %v608_v4  ;;  %342 = vst [vmem:[#allocation2] sm:$0x3] %v608_v4  ;;  %520 = vmatprep.mubr.msk.bf16.mxu0 %vm609_vm0, %v608_v4  ;;  %v275_v7 = vld [vmem:[%s706_s0] sm:$0xf]  ;;  %s506_s6 = sshll.u32 %s717_s14, 2  ;;  %s507_s10 = sshll.u32 %s717_s14, 1 }
  0x1d   : > { %517 = vmatpush3.bf16.msra.mxu0 %v566_v5  ;;  %s269_s9 = scalar_lea.vmem %s708_s2, %s506_s6  ;;  %s273_s18 = scalar_lea.vmem %s709_s3, %s507_s10 }
  0x1e   : > { %518 = vmatprep.subr.bf16.mxu0 %v608_v4 }
  0x21   : > { %519 = vmatpush3.bf16.msra.mxu0 %v567_v6 }
  0x23   : > { %v343_v23 = vld [vmem:[#allocation2] sm:$0x1]  ;;  %v352_v26 = vld [vmem:[#allocation2 + $0x1] sm:$0x1] }
  0x24   : > { %521 = vmatmul.mubr.msk.bf16.vlgmr.msra.gmra.mxu0 %vm292_vm1, %v275_v7 }
  0xe4   : > { %v330_v8 = vpop.f32.mrf.mxu0 }
  0xe5   : > { %v336_v9 = vpack.c.bf16 %v330_v8, %v330_v8  ;;  %v344_v10 = vrot.slane %v330_v8, 4  ;;  %v353_v11 = vmul.f32 %v330_v8, %v330_v8 }
  0xe6   : > { %v522_v12 = vpop.f32.mrf.mxu0 }
  0xe7   : > { %337 = vst [vmem:[%s269_s9] sm:$0xf] %v336_v9  ;;  %v345_v13 = vadd.f32 %v344_v10, %v330_v8  ;;  %v354_v14 = vrot.slane %v353_v11, 4 }
  0xe8   : > { %v333_v15 = vpop.f32.mrf.mxu0 }
  0xe9   : > { %v346_v16 = vrot.slane %v345_v13, 2  ;;  %v355_v17 = vadd.f32 %v354_v14, %v353_v11 }
  0xea   : > { %v523_v18 = vpop.f32.mrf.mxu0 }
  0xeb   : > { %v347_v19 = vadd.f32 %v346_v16, %v345_v13  ;;  %v356_v20 = vrot.slane %v355_v17, 2 }
  0xed   : > { %v348_v21 = vrot.slane %v347_v19, 1  ;;  %v357_v22 = vadd.f32 %v356_v20, %v355_v17 }
  0xef   : > { %v349_v24 = vadd.f32 %v348_v21, %v347_v19  ;;  %v358_v25 = vrot.slane %v357_v22, 1 }
  0xf1   : > { %v350_v27 = vadd.f32 %v349_v24, %v343_v23  ;;  %v359_v28 = vadd.f32 %v358_v25, %v357_v22 }
  0xf3   : > { %351 = vst [vmem:[#allocation2] sm:$0x1] %v350_v27  ;;  %v360_v29 = vadd.f32 %v359_v28, %v352_v26 }
  0xf5   : > { %361 = vst [vmem:[#allocation2 + $0x1] sm:$0x1] %v360_v29 }
  0xfc   : > { %v365_v30 = vld [vmem:[#allocation2] sm:$0x3] }
  0xfd   : > { %366 = vst [vmem:[%s273_s18] sm:$0x3] %v365_v30 }
  0xfe PF: > { %s14_s16 = sadd.s32 1, %s606_s16   ;;  %s710_s12 = smov %s594_s13 }
  0xff   : > { %p11_p10 = scmp.ge.s32.totalorder %s14_s16, 4   ;;  %s711_s13 = smov %s665_s20 }
 0x100   : > { %s712_s14 = smov %s602_s15  ;;  %s713_s15 = smov %s715_s17 }
 0x101   :  { %13 = sbr.rel (!%p11_p10) target bundleno = 3 (0x3), region = 127 }

// kernel: _lambda_.6
= control target key start
LH: loop header
LB: loop body
LE: loop exit
PB: predicated region body
PF: predicated region fallthrough
CT: control target
= control target key end

     0   :  { %v58_v0 = vmov 0.0   ;;  %s78_s0 = inlined_call_operand.vmem [shape: bf16[24,128], index: 0, kind: input, shape index: {}]   ;;  %s79_s1 = inlined_call_operand.vmem [shape: f32[2,128], index: 1, kind: output, shape index: {}]  }
   0x1   :  { %12 = vst [vmem:[#allocation2] sm:$0x3] %v58_v0  ;;  %v54_v1 = vld [vmem:[%s78_s0] sm:$0xff]   ;;  %v15_v2 = vld [vmem:[%s78_s0 + $0x8] sm:$0xf] }
   0x2   :  { %v55_v3 = vunpack.c.l.bf16 %v54_v1  ;;  %v56_v4 = vunpack.c.h.bf16 %v54_v1  ;;  %v18_v5 = vunpack.c.l.bf16 %v15_v2 }
   0x4   :  { %v20_v6 = vadd.f32 %v56_v4, %v55_v3  ;;  %v31_v7 = vmul.f32 %v55_v3, %v55_v3  ;;  %v32_v8 = vmul.f32 %v56_v4, %v56_v4  ;;  %v33_v9 = vmul.f32 %v18_v5, %v18_v5 }
   0x6   :  { %v21_v10 = vadd.f32 %v20_v6, %v18_v5  ;;  %v34_v11 = vadd.f32 %v32_v8, %v31_v7 }
   0x8   :  { %v22_v12 = vrot.slane %v21_v10, 4  ;;  %v35_v13 = vadd.f32 %v34_v11, %v33_v9  ;;  %v19_v22 = vld [vmem:[#allocation2] sm:$0x1]  ;;  %v30_v25 = vld [vmem:[#allocation2 + $0x1] sm:$0x1] }
   0xa   :  { %v23_v14 = vadd.f32 %v22_v12, %v21_v10  ;;  %v36_v15 = vrot.slane %v35_v13, 4 }
   0xc   :  { %v24_v16 = vrot.slane %v23_v14, 2  ;;  %v37_v17 = vadd.f32 %v36_v15, %v35_v13 }
   0xe   :  { %v25_v18 = vadd.f32 %v24_v16, %v23_v14  ;;  %v38_v19 = vrot.slane %v37_v17, 2 }
  0x10   :  { %v26_v20 = vrot.slane %v25_v18, 1  ;;  %v39_v21 = vadd.f32 %v38_v19, %v37_v17 }
  0x12   :  { %v27_v23 = vadd.f32 %v26_v20, %v25_v18  ;;  %v40_v24 = vrot.slane %v39_v21, 1 }
  0x14   :  { %v28_v26 = vadd.f32 %v27_v23, %v19_v22  ;;  %v41_v27 = vadd.f32 %v40_v24, %v39_v21 }
  0x16   :  { %29 = vst [vmem:[#allocation2] sm:$0x1] %v28_v26  ;;  %v42_v28 = vadd.f32 %v41_v27, %v30_v25 }
  0x18   :  { %43 = vst [vmem:[#allocation2 + $0x1] sm:$0x1] %v42_v28 }
  0x1f   :  { %v47_v29 = vld [vmem:[#allocation2] sm:$0x3] }
  0x20   :  { %48 = vst [vmem:[%s79_s1] sm:$0x3] %v47_v29 }

// kernel: _lambda_.7
= control target key start
LH: loop header
LB: loop body
LE: loop exit
PB: predicated region body
PF: predicated region fallthrough
CT: control target
= control target key end

     0   :  { %s1084_s15 = smov 0   ;;  %s1086_s16 = smov 0   ;;  %s1225_s0 = inlined_call_operand.vmem [shape: bf16[384,8], index: 0, kind: input, shape index: {}]   ;;  %s1226_s1 = inlined_call_operand.vmem [shape: f32[1,8], index: 1, kind: input, shape index: {}]   ;;  %s1227_s2 = inlined_call_operand.vmem [shape: f32[1,8], index: 2, kind: input, shape index: {}]   ;;  %s1228_s3 = inlined_call_operand.vmem [shape: bf16[8,128], index: 3, kind: input, shape index: {}]   ;;  %s1229_s4 = inlined_call_operand.vmem [shape: bf16[384,128], index: 4, kind: output, shape index: {}]  }
   0x1   :  { %s1088_s17 = smov 0  }
   0x2 LB: > { %s26_s18 = sadd.s32 1, %s1053_s16  ;;  %p771_p0 = scmp.ge.s32.totalorder %s1057_s17, 1  ;;  %s1057_s17 = sphi %s1088_s17, %s14_s17   ;;  %s1053_s16 = sphi %s1086_s16, %s1231_s16   ;;  %s1049_s15 = sphi %s1084_s15, %s1230_s15  }
   0x3   : > { %p28_p1 = scmp.ge.s32.totalorder %s26_s18, 2  ;;  %p186_p2 = scmp.lt.s32.totalorder %s1057_s17, 3 }
   0x5   : > { %s1233_s18 = smov (%p28_p1, %s26_s18), 0  ;;  %p187_p3 = pnand %p771_p0, %p186_p2 }
   0x6   : > { %s219_s21 = smul.u32 (!%p187_p3), 24, %s1049_s15 }
   0x7   : > { %190 = sbr.rel (%p187_p3) target bundleno = 249 (0xf9), region = 36 }
   0x8   : > { %p220_p4 = scmp.lt.s32.totalorder (!%p187_p3), %s219_s21, 47 }
   0xc   : > { %v385_v0 = vld [vmem:[%s1228_s3] sm:$0xf]  ;;  %vm423_vm0 = vcmask 1043456   ;;  %s1235_s21 = smov (!%p220_p4, %s219_s21), 47  ;;  %vm386_vm1 = vcmask 64512  }
   0xd   : > { %1009 = vmatprep.subr.msk.bf16.mxu0 %vm423_vm0, %v385_v0  ;;  %1010 = vmatprep.subr.msk.bf16.mxu1 %vm423_vm0, %v385_v0  ;;  %v425_v1 = vsel %vm423_vm0, %v385_v0, 0  ;;  %s772_s22 = sshll.u32 %s1235_s21, 2  ;;  %v1118_v2 = vld [vmem:[%s1226_s1] ss:$0 sm:$0xff] }
   0xe   : > { %982 = vmatpush3.bf16.msra.mxu0 %v425_v1  ;;  %1008 = vmatpush3.bf16.msra.mxu1 %v425_v1  ;;  %s1113_s25 = scalar_lea.vmem %s1225_s0, %s772_s22  ;;  %v1127_v11 = vld [vmem:[%s1227_s2] ss:$0 sm:$0xff]  ;;  %s1202_s6 = scalar_lea.vmem %s1229_s4, %s772_s22 }
   0xf   : > { %v839_v3 = vld [vmem:[%s1113_s25] sm:$0xff]   ;;  %v951_v4 = vld [vmem:[%s1113_s25 + $0x30] sm:$0xff]   ;;  %v946_v5 = vld [vmem:[%s1113_s25 + $0x8] sm:$0xff]  }
  0x10   : > { %v840_v6 = vunpack.c.l.bf16 %v839_v3  ;;  %v841_v7 = vunpack.c.h.bf16 %v839_v3  ;;  %v864_v8 = vunpack.c.l.bf16 %v951_v4  ;;  %v865_v9 = vunpack.c.h.bf16 %v951_v4  ;;  %v952_v10 = vld [vmem:[%s1113_s25 + $0x38] sm:$0xff]   ;;  %v947_v32 = vld [vmem:[%s1113_s25 + $0x10] sm:$0xff]   ;;  %v953_v37 = vld [vmem:[%s1113_s25 + $0x40] sm:$0xff]  }
  0x11   : > { %v844_v12 = vunpack.c.l.bf16 %v946_v5  ;;  %v845_v13 = vunpack.c.h.bf16 %v946_v5  ;;  %v868_v14 = vunpack.c.l.bf16 %v952_v10  ;;  %v869_v15 = vunpack.c.h.bf16 %v952_v10  ;;  %v948_v42 = vld [vmem:[%s1113_s25 + $0x18] sm:$0xff]   ;;  %v954_v47 = vld [vmem:[%s1113_s25 + $0x48] sm:$0xff]   ;;  %v949_v5 = vld [vmem:[%s1113_s25 + $0x20] sm:$0xff]  }
  0x12   : > { %v294_v16 = vmul.f32 %v840_v6, %v1118_v2  ;;  %v295_v17 = vmul.f32 %v841_v7, %v1118_v2  ;;  %v306_v18 = vmul.f32 %v864_v8, %v1118_v2  ;;  %v307_v19 = vmul.f32 %v865_v9, %v1118_v2 }
  0x13   : > { %v296_v20 = vmul.f32 %v844_v12, %v1118_v2  ;;  %v297_v21 = vmul.f32 %v845_v13, %v1118_v2  ;;  %v308_v22 = vmul.f32 %v868_v14, %v1118_v2  ;;  %v309_v23 = vmul.f32 %v869_v15, %v1118_v2  ;;  %v955_v15 = vld [vmem:[%s1113_s25 + $0x50] sm:$0xff]  }
  0x14   : > { %v325_v24 = vadd.f32 %v1127_v11, %v294_v16  ;;  %v326_v25 = vadd.f32 %v1127_v11, %v295_v17  ;;  %v337_v26 = vadd.f32 %v1127_v11, %v306_v18  ;;  %v338_v27 = vadd.f32 %v1127_v11, %v307_v19 }
  0x15   : > { %v327_v28 = vadd.f32 %v1127_v11, %v296_v20  ;;  %v328_v29 = vadd.f32 %v1127_v11, %v297_v21  ;;  %v339_v30 = vadd.f32 %v1127_v11, %v308_v22  ;;  %v340_v31 = vadd.f32 %v1127_v11, %v309_v23  ;;  %v950_v20 = vld [vmem:[%s1113_s25 + $0x28] sm:$0xff]  }
  0x16   : > { %v349_v33 = vmax.f32 %v325_v24, 0.0  ;;  %v350_v34 = vmax.f32 %v326_v25, 0.0  ;;  %v361_v35 = vmax.f32 %v337_v26, 0.0  ;;  %v362_v36 = vmax.f32 %v338_v27, 0.0  ;;  %v956_v25 = vld [vmem:[%s1113_s25 + $0x58] sm:$0xff]  }
  0x17   : > { %v351_v38 = vmax.f32 %v327_v28, 0.0  ;;  %v352_v39 = vmax.f32 %v328_v29, 0.0  ;;  %v363_v40 = vmax.f32 %v339_v30, 0.0  ;;  %v364_v41 = vmax.f32 %v340_v31, 0.0 }
  0x18   : > { %v373_v43 = vpack.c.bf16 %v350_v34, %v349_v33  ;;  %v379_v44 = vpack.c.bf16 %v362_v36, %v361_v35  ;;  %v848_v45 = vunpack.c.l.bf16 %v947_v32  ;;  %v849_v46 = vunpack.c.h.bf16 %v947_v32 }
  0x19   : > { %v374_v48 = vpack.c.bf16 %v352_v39, %v351_v38  ;;  %v380_v49 = vpack.c.bf16 %v364_v41, %v363_v40  ;;  %v872_v50 = vunpack.c.l.bf16 %v953_v37  ;;  %v873_v51 = vunpack.c.h.bf16 %v953_v37 }
  0x1a   : > { %983 = vmatprep.mubr.msk.bf16.mxu0 %vm386_vm1, %v373_v43  ;;  %995 = vmatprep.mubr.msk.bf16.mxu1 %vm386_vm1, %v379_v44  ;;  %v298_v52 = vmul.f32 %v848_v45, %v1118_v2  ;;  %v299_v53 = vmul.f32 %v849_v46, %v1118_v2  ;;  %v852_v54 = vunpack.c.l.bf16 %v948_v42  ;;  %v853_v55 = vunpack.c.h.bf16 %v948_v42 }
  0x1b   : > { %984 = vmatmul.mubr.msk.bf16.vlgmr.msra.gmra.mxu0 %vm386_vm1, %v374_v48  ;;  %996 = vmatmul.mubr.msk.bf16.vlgmr.msra.gmra.mxu1 %vm386_vm1, %v380_v49  ;;  %v310_v56 = vmul.f32 %v872_v50, %v1118_v2  ;;  %v311_v57 = vmul.f32 %v873_v51, %v1118_v2  ;;  %v876_v58 = vunpack.c.l.bf16 %v954_v47  ;;  %v877_v59 = vunpack.c.h.bf16 %v954_v47 }
  0x1c   : > { %v329_v60 = vadd.f32 %v1127_v11, %v298_v52  ;;  %v330_v61 = vadd.f32 %v1127_v11, %v299_v53  ;;  %v300_v62 = vmul.f32 %v852_v54, %v1118_v2  ;;  %v301_v63 = vmul.f32 %v853_v55, %v1118_v2 }
  0x1d   : > { %v341_v0 = vadd.f32 %v1127_v11, %v310_v56  ;;  %v342_v1 = vadd.f32 %v1127_v11, %v311_v57  ;;  %v312_v3 = vmul.f32 %v876_v58, %v1118_v2  ;;  %v313_v4 = vmul.f32 %v877_v59, %v1118_v2 }
  0x1e   : > { %v353_v6 = vmax.f32 %v329_v60, 0.0  ;;  %v354_v7 = vmax.f32 %v330_v61, 0.0  ;;  %v331_v8 = vadd.f32 %v1127_v11, %v300_v62  ;;  %v332_v9 = vadd.f32 %v1127_v11, %v301_v63 }
  0x1f   : > { %v365_v10 = vmax.f32 %v341_v0, 0.0  ;;  %v366_v12 = vmax.f32 %v342_v1, 0.0  ;;  %v343_v13 = vadd.f32 %v1127_v11, %v312_v3  ;;  %v344_v14 = vadd.f32 %v1127_v11, %v313_v4 }
  0x20   : > { %v375_v16 = vpack.c.bf16 %v354_v7, %v353_v6  ;;  %v355_v17 = vmax.f32 %v331_v8, 0.0  ;;  %v356_v18 = vmax.f32 %v332_v9, 0.0  ;;  %v856_v19 = vunpack.c.l.bf16 %v949_v5 }
  0x21   : > { %v381_v21 = vpack.c.bf16 %v366_v12, %v365_v10  ;;  %v367_v22 = vmax.f32 %v343_v13, 0.0  ;;  %v368_v23 = vmax.f32 %v344_v14, 0.0  ;;  %v857_v24 = vunpack.c.h.bf16 %v949_v5 }
  0x22   : > { %987 = vmatprep.mubr.msk.bf16.mxu0 %vm386_vm1, %v375_v16  ;;  %v376_v26 = vpack.c.bf16 %v356_v18, %v355_v17  ;;  %v302_v27 = vmul.f32 %v856_v19, %v1118_v2  ;;  %v880_v28 = vunpack.c.l.bf16 %v955_v15  ;;  %v881_v29 = vunpack.c.h.bf16 %v955_v15 }
  0x23   : > { %999 = vmatprep.mubr.msk.bf16.mxu1 %vm386_vm1, %v381_v21  ;;  %v382_v30 = vpack.c.bf16 %v368_v23, %v367_v22  ;;  %v303_v31 = vmul.f32 %v857_v24, %v1118_v2  ;;  %v860_v32 = vunpack.c.l.bf16 %v950_v20  ;;  %v861_v33 = vunpack.c.h.bf16 %v950_v20 }
  0x24   : > { %988 = vmatmul.mubr.msk.bf16.gmra.mxu0 %vm386_vm1, %v376_v26  ;;  %v333_v34 = vadd.f32 %v1127_v11, %v302_v27  ;;  %v314_v35 = vmul.f32 %v880_v28, %v1118_v2  ;;  %v315_v36 = vmul.f32 %v881_v29, %v1118_v2  ;;  %v884_v37 = vunpack.c.l.bf16 %v956_v25 }
  0x25   : > { %1000 = vmatmul.mubr.msk.bf16.gmra.mxu1 %vm386_vm1, %v382_v30  ;;  %v334_v38 = vadd.f32 %v1127_v11, %v303_v31  ;;  %v304_v39 = vmul.f32 %v860_v32, %v1118_v2  ;;  %v305_v40 = vmul.f32 %v861_v33, %v1118_v2  ;;  %v885_v41 = vunpack.c.h.bf16 %v956_v25 }
  0x26   : > { %v357_v42 = vmax.f32 %v333_v34, 0.0  ;;  %v345_v43 = vadd.f32 %v1127_v11, %v314_v35  ;;  %v346_v44 = vadd.f32 %v1127_v11, %v315_v36  ;;  %v316_v45 = vmul.f32 %v884_v37, %v1118_v2 }
  0x27   : > { %v358_v46 = vmax.f32 %v334_v38, 0.0  ;;  %v335_v47 = vadd.f32 %v1127_v11, %v304_v39  ;;  %v336_v48 = vadd.f32 %v1127_v11, %v305_v40  ;;  %v317_v49 = vmul.f32 %v885_v41, %v1118_v2 }
  0x28   : > { %v369_v50 = vmax.f32 %v345_v43, 0.0  ;;  %v370_v51 = vmax.f32 %v346_v44, 0.0  ;;  %v347_v52 = vadd.f32 %v1127_v11, %v316_v45 }
  0x29   : > { %v377_v53 = vpack.c.bf16 %v358_v46, %v357_v42  ;;  %v359_v54 = vmax.f32 %v335_v47, 0.0  ;;  %v360_v55 = vmax.f32 %v336_v48, 0.0  ;;  %v348_v56 = vadd.f32 %v1127_v11, %v317_v49 }
  0x2a   : > { %v383_v57 = vpack.c.bf16 %v370_v51, %v369_v50  ;;  %v371_v58 = vmax.f32 %v347_v52, 0.0 }
  0x2b   : > { %991 = vmatprep.mubr.msk.bf16.mxu0 %vm386_vm1, %v377_v53  ;;  %v378_v59 = vpack.c.bf16 %v360_v55, %v359_v54  ;;  %v372_v60 = vmax.f32 %v348_v56, 0.0 }
  0x2c   : > { %1003 = vmatprep.mubr.msk.bf16.mxu1 %vm386_vm1, %v383_v57 }
  0x2d   : > { %992 = vmatmul.mubr.msk.bf16.gmra.mxu0 %vm386_vm1, %v378_v59  ;;  %v384_v2 = vpack.c.bf16 %v372_v60, %v371_v58 }
  0x2f   : > { %1004 = vmatmul.mubr.msk.bf16.gmra.mxu1 %vm386_vm1, %v384_v2 }
  0xdb   : > { %v985_v61 = vpop.f32.mrf.mxu0  ;;  %v997_v62 = vpop.f32.mrf.mxu1 }
  0xdd   : > { %v461_v63 = vpop.f32.mrf.mxu0  ;;  %v509_v0 = vpop.f32.mrf.mxu1 }
  0xdf   : > { %v986_v11 = vpop.f32.mrf.mxu0  ;;  %v998_v1 = vpop.f32.mrf.mxu1 }
  0xe0   : > { %v894_v3 = vpack.c.bf16 %v986_v11, %v985_v61  ;;  %v924_v4 = vpack.c.bf16 %v998_v1, %v997_v62 }
  0xe1   : > { %v464_v5 = vpop.f32.mrf.mxu0  ;;  %v512_v6 = vpop.f32.mrf.mxu1 }
  0xe2   : > { %957 = vst [vmem:[%s1202_s6 + $0x8] sm:$0xff] %v894_v3   ;;  %963 = vst [vmem:[%s1202_s6 + $0x38] sm:$0xff] %v924_v4   ;;  %v889_v7 = vpack.c.bf16 %v464_v5, %v461_v63  ;;  %v919_v8 = vpack.c.bf16 %v512_v6, %v509_v0 }
  0xe4   : > { %890 = vst [vmem:[%s1202_s6] sm:$0xff] %v889_v7   ;;  %962 = vst [vmem:[%s1202_s6 + $0x30] sm:$0xff] %v919_v8   ;;  %v989_v9 = vpop.f32.mrf.mxu0 }
  0xe5   : > { %v1001_v10 = vpop.f32.mrf.mxu1 }
  0xe6   : > { %v477_v12 = vpop.f32.mrf.mxu0 }
  0xe7   : > { %v525_v13 = vpop.f32.mrf.mxu1 }
  0xe8   : > { %v990_v14 = vpop.f32.mrf.mxu0 }
  0xe9   : > { %v904_v15 = vpack.c.bf16 %v990_v14, %v989_v9  ;;  %v1002_v16 = vpop.f32.mrf.mxu1 }
  0xea   : > { %v934_v17 = vpack.c.bf16 %v1002_v16, %v1001_v10  ;;  %v480_v18 = vpop.f32.mrf.mxu0 }
  0xeb   : > { %959 = vst [vmem:[%s1202_s6 + $0x18] sm:$0xff] %v904_v15   ;;  %v899_v19 = vpack.c.bf16 %v480_v18, %v477_v12  ;;  %v528_v20 = vpop.f32.mrf.mxu1 }
  0xec   : > { %965 = vst [vmem:[%s1202_s6 + $0x48] sm:$0xff] %v934_v17   ;;  %v929_v21 = vpack.c.bf16 %v528_v20, %v525_v13 }
  0xed   : > { %958 = vst [vmem:[%s1202_s6 + $0x10] sm:$0xff] %v899_v19   ;;  %v993_v22 = vpop.f32.mrf.mxu0 }
  0xee   : > { %964 = vst [vmem:[%s1202_s6 + $0x40] sm:$0xff] %v929_v21  }
  0xef   : > { %v1005_v23 = vpop.f32.mrf.mxu1  ;;  %v493_v24 = vpop.f32.mrf.mxu0 }
  0xf1   : > { %v541_v25 = vpop.f32.mrf.mxu1  ;;  %v994_v26 = vpop.f32.mrf.mxu0 }
  0xf2   : > { %v914_v27 = vpack.c.bf16 %v994_v26, %v993_v22 }
  0xf3   : > { %v1006_v28 = vpop.f32.mrf.mxu1  ;;  %v496_v29 = vpop.f32.mrf.mxu0 }
  0xf4   : > { %961 = vst [vmem:[%s1202_s6 + $0x28] sm:$0xff] %v914_v27   ;;  %v944_v30 = vpack.c.bf16 %v1006_v28, %v1005_v23  ;;  %v909_v31 = vpack.c.bf16 %v496_v29, %v493_v24 }
  0xf5   : > { %v544_v32 = vpop.f32.mrf.mxu1 }
  0xf6   : > { %967 = vst [vmem:[%s1202_s6 + $0x58] sm:$0xff] %v944_v30   ;;  %960 = vst [vmem:[%s1202_s6 + $0x20] sm:$0xff] %v909_v31   ;;  %v939_v33 = vpack.c.bf16 %v544_v32, %v541_v25 }
  0xf8   : > { %966 = vst [vmem:[%s1202_s6 + $0x50] sm:$0xff] %v939_v33  }
  0xf9 PF: > { %s14_s17 = sadd.s32 1, %s1057_s17   ;;  %s1230_s15 = smov %s1053_s16 }
  0xfa   : > { %p11_p5 = scmp.ge.s32.totalorder %s14_s17, 4   ;;  %s1231_s16 = smov %s1233_s18 }
  0xfc   :  { %13 = sbr.rel (!%p11_p5) target bundleno = 2 (0x2), region = 69 }

</bundles_post_ra>
